<compile_context>
chip_gen: v7x
topology: tpu7x:2x2x1
jax: 0.10.0
libtpu: 0.0.40
codegen_flags: <defaults>
</compile_context>

<pallas_src>
import functools
import math

import jax
import jax.numpy as jnp
from jax.experimental import pallas as pl
from jax.experimental.pallas import tpu as pltpu


# ----------------------------------------------------------------------------
# Kernel 1: one fused GCN layer  out = act( (adj @ H) @ W )
#   adj : (N, N)        bf16, tiled (tm, tk)          (streamed once)
#   h   : (N, C_in)     bf16, VMEM-resident full block (streamed once)
#   w   : (C_in, C_out) bf16, VMEM-resident full block
#   out : (N, C_out)    tiled (tm, C_out)
# Grid = (rows, reduction); f32 accumulator scratch; finalize on last k.
# ----------------------------------------------------------------------------
def gcn_layer_kernel(adj_ref, h_ref, w_ref, out_ref, acc_ref, *,
                     apply_relu, tk):
    k = pl.program_id(1)

    @pl.when(k == 0)
    def _():
        acc_ref[...] = jnp.zeros_like(acc_ref)

    # Slice the resident feature matrix along the reduction dim.
    start = pl.multiple_of(k * tk, tk)
    h_blk = h_ref[pl.ds(start, tk), :]                       # (tk, C_in) bf16

    # bf16 MXU matmul, f32 accumulation.
    acc_ref[...] += jnp.dot(adj_ref[...], h_blk,
                            preferred_element_type=jnp.float32)

    @pl.when(k == pl.num_programs(1) - 1)
    def _():
        # Fold the feature transform into the finalize step: (A @ H) @ W.
        h = jnp.dot(acc_ref[...].astype(jnp.bfloat16), w_ref[...],
                    preferred_element_type=jnp.float32)
        if apply_relu:
            h = jnp.maximum(h, 0.0)          # elementwise in f32 (v5e-friendly)
        out_ref[...] = h.astype(out_ref.dtype)


def _gcn_vmem_limit(n, c_in, c_out, tm, tk, out_itemsize):
    # Double-buffer everything BlockSpec manages (conservative), plus scratch.
    need = (2 * tm * tk * 2            # adj tiles (bf16)
            + 2 * n * c_in * 2         # resident features (bf16)
            + 2 * c_in * c_out * 2     # resident weights (bf16)
            + tm * c_in * 4            # f32 accumulator scratch
            + 2 * tm * c_out * out_itemsize)
    limit = int(need * 1.5) + (2 << 20)          # headroom
    return min(max(limit, 4 << 20), 64 << 20)    # v7x-safe cap


def gcn_layer(adj, h, w, *, apply_relu, out_dtype, tm, tk):
    n = adj.shape[0]
    c_in = h.shape[1]
    c_out = w.shape[1]
    assert n % tm == 0 and n % tk == 0, "node count must be tile-divisible"
    out_itemsize = jnp.dtype(out_dtype).itemsize
    return pl.pallas_call(
        functools.partial(gcn_layer_kernel, apply_relu=apply_relu, tk=tk),
        out_shape=jax.ShapeDtypeStruct((n, c_out), out_dtype),
        grid_spec=pltpu.PrefetchScalarGridSpec(
            num_scalar_prefetch=0,
            grid=(n // tm, n // tk),                       # reduction axis last
            in_specs=[
                pl.BlockSpec((tm, tk), lambda i, k: (i, k)),       # adj tile
                pl.BlockSpec((n, c_in), lambda i, k: (0, 0)),      # resident H
                pl.BlockSpec((c_in, c_out), lambda i, k: (0, 0)),  # weights
            ],
            out_specs=pl.BlockSpec((tm, c_out), lambda i, k: (i, 0)),
            scratch_shapes=[pltpu.VMEM((tm, c_in), jnp.float32)],
        ),
        compiler_params=pltpu.CompilerParams(
            dimension_semantics=("parallel", "arbitrary"),
            vmem_limit_bytes=_gcn_vmem_limit(n, c_in, c_out, tm, tk,
                                             out_itemsize),
        ),
    )(adj, h, w)


# ----------------------------------------------------------------------------
# Kernel 2: readout + rank-1 discriminator + BCE-with-logits loss.
#   h2   : (N, 2*Hp) bf16 — lane-stacked [positive | negative] embeddings,
#          tiled over rows and streamed twice (two phases).
#   wdt  : (Hp, Hp)  f32  — zero-padded discriminator weight, TRANSPOSED.
#   loss : (1, 1)    f32 in SMEM.
# Grid = (phase, row_tile):
#   phase 0: accumulate sum of positive rows into VMEM scratch.
#   phase 1 (i==0): summary = sigmoid(sum/N); sv = summary @ Wd^T (rank-1).
#   phase 1: logits = lane-reduce(pos * sv); accumulate softplus sums in SMEM.
# ----------------------------------------------------------------------------
def dgi_readout_kernel(h2_ref, wdt_ref, loss_ref,
                       sum_sc, sv_sc, acc_sc, *, hp, n_nodes):
    phase = pl.program_id(0)
    i = pl.program_id(1)
    n_row = pl.num_programs(1)

    h2 = h2_ref[...].astype(jnp.float32)          # (tr, 2*Hp) in f32
    pos = h2[:, :hp]                              # (tr, Hp)
    neg = h2[:, hp:]                              # (tr, Hp)

    @pl.when(jnp.logical_and(phase == 0, i == 0))
    def _():
        sum_sc[...] = jnp.zeros_like(sum_sc)

    @pl.when(phase == 0)
    def _():
        sum_sc[...] += jnp.sum(pos, axis=0, keepdims=True)        # (1, Hp)

    @pl.when(jnp.logical_and(phase == 1, i == 0))
    def _():
        # summary = sigmoid(mean over nodes of positive embeddings)
        summary = jax.nn.sigmoid(sum_sc[...] * (1.0 / n_nodes))   # (1, Hp)
        # sv = Wd @ summary  ==  summary_row @ Wd^T   (tiny lane-dense matmul)
        sv_sc[...] = jnp.dot(summary, wdt_ref[...],
                             preferred_element_type=jnp.float32)  # (1, Hp)
        acc_sc[0] = 0.0

    @pl.when(phase == 1)
    def _():
        sv = sv_sc[...]                                           # (1, Hp)
        # Rank-1 discriminator: VPU multiply + XLU lane reduce (no NxHp matmul)
        pos_logits = jnp.sum(pos * sv, axis=1, keepdims=True)     # (tr, 1)
        neg_logits = jnp.sum(neg * sv, axis=1, keepdims=True)     # (tr, 1)
        # BCEWithLogits(x, 1) = softplus(-x); BCEWithLogits(x, 0) = softplus(x)
        l1 = jnp.sum(jnp.logaddexp(0.0, -pos_logits))
        l2 = jnp.sum(jnp.logaddexp(0.0, neg_logits))
        acc_sc[0] += l1 + l2

    @pl.when(jnp.logical_and(phase == 1, i == n_row - 1))
    def _():
        loss_ref[0, 0] = acc_sc[0] * (1.0 / n_nodes)


def dgi_readout(h2, wdt, *, hp, tr):
    n = h2.shape[0]
    assert n % tr == 0
    c = h2.shape[1]
    need = 2 * tr * c * h2.dtype.itemsize + 2 * hp * hp * 4 + 2 * hp * 4
    vmem_limit = min(max(int(need * 1.5) + (2 << 20), 4 << 20), 64 << 20)
    return pl.pallas_call(
        functools.partial(dgi_readout_kernel, hp=hp, n_nodes=float(n)),
        out_shape=jax.ShapeDtypeStruct((1, 1), jnp.float32),
        grid_spec=pltpu.PrefetchScalarGridSpec(
            num_scalar_prefetch=0,
            grid=(2, n // tr),                    # (phase, row tile)
            in_specs=[
                pl.BlockSpec((tr, c), lambda p, i: (i, 0)),      # h2 row tile
                pl.BlockSpec((hp, hp), lambda p, i: (0, 0)),     # Wd^T resident
            ],
            out_specs=pl.BlockSpec(memory_space=pltpu.MemorySpace.SMEM),
            scratch_shapes=[
                pltpu.VMEM((1, hp), jnp.float32),   # running pos-sum
                pltpu.VMEM((1, hp), jnp.float32),   # sv = summary @ Wd^T
                pltpu.SMEM((1,), jnp.float32),      # scalar loss accumulator
            ],
        ),
        compiler_params=pltpu.CompilerParams(
            dimension_semantics=("arbitrary", "arbitrary"),
            vmem_limit_bytes=vmem_limit,
        ),
    )(h2, wdt)


# ----------------------------------------------------------------------------
# Host-side helpers and the full forward pass.
# ----------------------------------------------------------------------------
def _pad2d(a, rows, cols):
    out = jnp.zeros((rows, cols), a.dtype)
    return out.at[: a.shape[0], : a.shape[1]].set(a)


def _block_diag(a, b):
    r1, c1 = a.shape
    r2, c2 = b.shape
    out = jnp.zeros((r1 + r2, c1 + c2), a.dtype)
    out = out.at[:r1, :c1].set(a)
    out = out.at[r1:, c1:].set(b)
    return out


def _pick_tiles(n, tm_req, tk_req):
    tm = min(tm_req, n)
    # v7x megacore: keep the parallel row axis >= 2 tiles when possible.
    while tm > 128 and n // tm < 2:
        tm //= 2
    tk = min(tk_req, n)
    while n % tm != 0 and tm > 8:
        tm //= 2
    while n % tk != 0 and tk > 8:
        tk //= 2
    assert n % tm == 0 and n % tk == 0, "node count must be 8/128-friendly"
    return tm, tk


def dgi_forward(adj_norm, x, x_perm, w1, w2, wd, *, hp=128, tm=512, tk=512):
    n, f = x.shape
    assert hp % 128 == 0
    tm, tk = _pick_tiles(n, tm, tk)

    # Fuse positive / negative paths: lane-concat inputs, block-diag weights
    # (zero-padded so the hidden dim is lane-dense Hp=128 per path).
    xcat = jnp.concatenate([x, x_perm], axis=-1)          # (N, 2F)
    c_in1 = 2 * f
    c_in1_p = ((c_in1 + 127) // 128) * 128                # lane-dense input dim
    xcat = _pad2d(xcat, n, c_in1_p)

    w1p = _pad2d(w1, f, hp)                               # (F, Hp)
    w2p = _pad2d(w2, hp, hp)                              # (Hp, Hp)
    w1bd = _pad2d(_block_diag(w1p, w1p), c_in1_p, 2 * hp)  # (2F_p, 2Hp)
    w2bd = _block_diag(w2p, w2p)                          # (2Hp, 2Hp)
    wdt = _pad2d(wd, hp, hp).T                            # (Hp, Hp) transposed

    # bf16 MXU operands; accumulation / elementwise stays f32 inside kernels.
    adj_bf = adj_norm.astype(jnp.bfloat16)
    xcat_bf = xcat.astype(jnp.bfloat16)

    # Layer 1: h1 = relu(A_hat @ [X | Xperm] @ blockdiag(W1, W1))  (N, 2Hp) bf16
    h1 = gcn_layer(adj_bf, xcat_bf, w1bd.astype(jnp.bfloat16),
                   apply_relu=True, out_dtype=jnp.bfloat16, tm=tm, tk=tk)
    # Layer 2: h2 = A_hat @ h1 @ blockdiag(W2, W2)   (N, 2Hp) bf16 (halved HBM)
    h2 = gcn_layer(adj_bf, h1, w2bd.astype(jnp.bfloat16),
                   apply_relu=False, out_dtype=jnp.bfloat16, tm=tm, tk=tk)

    # Readout / rank-1 discriminator / loss (scalar output in SMEM).
    tr = min(512, n)
    while n % tr != 0 and tr > 8:
        tr //= 2
    loss2d = dgi_readout(h2, wdt.astype(jnp.float32), hp=hp, tr=tr)
    return loss2d[0, 0]


def _uniform_param(key, shape, fan):
    bound = 1.0 / math.sqrt(fan)
    return jax.random.uniform(key, shape, jnp.float32, -bound, bound)


def build_normalized_adjacency(n_nodes):
    # Deterministic ring graph + self loops, symmetric normalization.
    idx = jnp.arange(n_nodes)
    adj = jnp.zeros((n_nodes, n_nodes), jnp.float32)
    adj = adj.at[idx, (idx + 1) % n_nodes].set(1.0)
    adj = adj.at[(idx + 1) % n_nodes, idx].set(1.0)
    adj = adj + jnp.eye(n_nodes, dtype=jnp.float32)       # self loops
    deg = jnp.sum(adj, axis=1)
    d_inv_sqrt = 1.0 / jnp.sqrt(deg)
    return adj * d_inv_sqrt[:, None] * d_inv_sqrt[None, :]


if __name__ == "__main__":
    N_NODES = 256      # graph nodes (multiple of the tiles)
    IN_FEATS = 64      # so the fused [x | x_perm] input is 128 lanes wide
    N_HIDDEN = 32      # logical hidden size (padded to 128 inside the kernel)

    key = jax.random.PRNGKey(0)
    k_x, k_w1, k_w2, k_wd, k_perm = jax.random.split(key, 5)

    # inputs
    x = jax.random.normal(k_x, (N_NODES, IN_FEATS), jnp.float32)
    adj_norm = build_normalized_adjacency(N_NODES)

    # corruption: random node permutation of the features
    perm = jax.random.permutation(k_perm, N_NODES)
    x_perm = x[perm]

    # parameters (uniform(-1/sqrt(fan), 1/sqrt(fan)) like the torch module)
    w1 = _uniform_param(k_w1, (IN_FEATS, N_HIDDEN), IN_FEATS)    # GCN layer 1
    w2 = _uniform_param(k_w2, (N_HIDDEN, N_HIDDEN), N_HIDDEN)    # GCN layer 2
    wd = _uniform_param(k_wd, (N_HIDDEN, N_HIDDEN), N_HIDDEN)    # discriminator

    loss = dgi_forward(adj_norm, x, x_perm, w1, w2, wd)
    jax.block_until_ready(loss)

    # pure-JAX f32 reference check (kernel uses bf16 operands -> loose tol)
    def gcn_ref(xin):
        hh = jnp.maximum(adj_norm @ (xin @ w1), 0.0)
        return adj_norm @ (hh @ w2)

    pos = gcn_ref(x)
    neg = gcn_ref(x_perm)
    summ = jax.nn.sigmoid(jnp.mean(pos, axis=0))
    ws = wd @ summ
    pl_, nl_ = pos @ ws, neg @ ws
    ref = jnp.mean(jnp.logaddexp(0.0, -pl_)) + jnp.mean(jnp.logaddexp(0.0, nl_))
    assert jnp.allclose(loss, ref, rtol=5e-2, atol=5e-2), (loss, ref)

    print("KERNEL_OK")
</pallas_src>

<mosaic_0001>
module attributes {stable_mosaic.version = 11 : i64} {
  func.func @gcn_layer_kernel(%arg0: i32, %arg1: i32, %arg2: memref<128x256xbf16, #tpu.memory_space<vmem>>, %arg3: memref<256x128xbf16, #tpu.memory_space<vmem>>, %arg4: memref<128x256xbf16, #tpu.memory_space<vmem>>, %arg5: memref<128x256xbf16, #tpu.memory_space<vmem>>, %arg6: memref<128x128xf32, #tpu.memory_space<vmem>>) attributes {dimension_semantics = [#tpu.dimension_semantics<parallel>, #tpu.dimension_semantics<arbitrary>], iteration_bounds = array<i64: 2, 1>, scalar_prefetch = 0 : i64, scratch_operands = 1 : i64, tpu.core_type = #tpu.core_type<tc>, window_params = [{transform_indices = @transform_0, window_bounds = array<i64: 128, 256>}, {pipeline_mode = #tpu.pipeline_mode<synchronous>, transform_indices = @transform_1, window_bounds = array<i64: 256, 128>}, {pipeline_mode = #tpu.pipeline_mode<synchronous>, transform_indices = @transform_2, window_bounds = array<i64: 128, 256>}, {transform_indices = @transform_3, window_bounds = array<i64: 128, 256>}]} {
    %c0_i32 = arith.constant 0 : i32
    %0 = arith.cmpi eq, %arg1, %c0_i32 : i32
    %1 = arith.extui %0 : i1 to i32
    %c0_i32_0 = arith.constant 0 : i32
    %2 = arith.cmpi ne, %1, %c0_i32_0 : i32
    scf.if %2 {
      %cst_9 = arith.constant 0.000000e+00 : f32
      %15 = vector.broadcast %cst_9 : f32 to vector<128x128xf32>
      %c0_10 = arith.constant 0 : index
      %c0_11 = arith.constant 0 : index
      %16 = vector.load %arg6[%c0_10, %c0_11] : memref<128x128xf32, #tpu.memory_space<vmem>>, vector<128x128xf32>
      tpu.vector_store %arg6[%c0_10, %c0_11], %15 {strides = array<i32>} : memref<128x128xf32, #tpu.memory_space<vmem>>, vector<128x128xf32>,
    } else {
    }
    %c256_i32 = arith.constant 256 : i32
    %3 = arith.muli %arg1, %c256_i32 : i32
    %4 = tpu.assume_multiple %3, 256 : i32
    %5 = arith.index_cast %4 : i32 to index
    %c0 = arith.constant 0 : index
    %6 = vector.load %arg3[%5, %c0] : memref<256x128xbf16, #tpu.memory_space<vmem>>, vector<256x128xbf16>
    %c0_1 = arith.constant 0 : index
    %c0_2 = arith.constant 0 : index
    %7 = vector.load %arg6[%c0_1, %c0_2] : memref<128x128xf32, #tpu.memory_space<vmem>>, vector<128x128xf32>
    %c0_3 = arith.constant 0 : index
    %c0_4 = arith.constant 0 : index
    %8 = vector.load %arg2[%c0_3, %c0_4] : memref<128x256xbf16, #tpu.memory_space<vmem>>, vector<128x256xbf16>
    %cst = arith.constant dense<0.000000e+00> : vector<128x128xf32>
    %9 = tpu.matmul %8, %6, %cst {dimension_numbers = #tpu.dot_dimension_numbers<[1], [0], [0], [1], [0, 0, 1, 1], [], []>} : vector<128x256xbf16>, vector<256x128xbf16>, vector<128x128xf32> -> vector<128x128xf32>
    %10 = arith.addf %7, %9 : vector<128x128xf32>
    %c0_5 = arith.constant 0 : index
    %c0_6 = arith.constant 0 : index
    %11 = vector.load %arg6[%c0_5, %c0_6] : memref<128x128xf32, #tpu.memory_space<vmem>>, vector<128x128xf32>
    tpu.vector_store %arg6[%c0_5, %c0_6], %10 {strides = array<i32>} : memref<128x128xf32, #tpu.memory_space<vmem>>, vector<128x128xf32>,
    %c0_i32_7 = arith.constant 0 : i32
    %12 = arith.cmpi eq, %arg1, %c0_i32_7 : i32
    %13 = arith.extui %12 : i1 to i32
    %c0_i32_8 = arith.constant 0 : i32
    %14 = arith.cmpi ne, %13, %c0_i32_8 : i32
    scf.if %14 {
      %c0_9 = arith.constant 0 : index
      %c0_10 = arith.constant 0 : index
      %15 = vector.load %arg6[%c0_9, %c0_10] : memref<128x128xf32, #tpu.memory_space<vmem>>, vector<128x128xf32>
      %16 = arith.truncf %15 : vector<128x128xf32> to vector<128x128xbf16>
      %c0_11 = arith.constant 0 : index
      %c0_12 = arith.constant 0 : index
      %17 = vector.load %arg4[%c0_11, %c0_12] : memref<128x256xbf16, #tpu.memory_space<vmem>>, vector<128x256xbf16>
      %cst_13 = arith.constant dense<0.000000e+00> : vector<128x256xf32>
      %18 = tpu.matmul %16, %17, %cst_13 {dimension_numbers = #tpu.dot_dimension_numbers<[1], [0], [0], [1], [0, 0, 1, 1], [], []>} : vector<128x128xbf16>, vector<128x256xbf16>, vector<128x256xf32> -> vector<128x256xf32>
      %cst_14 = arith.constant 0.000000e+00 : f32
      %19 = vector.broadcast %cst_14 : f32 to vector<128x256xf32>
      %20 = arith.maximumf %18, %19 : vector<128x256xf32>
      %21 = arith.truncf %20 : vector<128x256xf32> to vector<128x256xbf16>
      %c0_15 = arith.constant 0 : index
      %c0_16 = arith.constant 0 : index
      %22 = vector.load %arg5[%c0_15, %c0_16] : memref<128x256xbf16, #tpu.memory_space<vmem>>, vector<128x256xbf16>
      tpu.vector_store %arg5[%c0_15, %c0_16], %21 {strides = array<i32>} : memref<128x256xbf16, #tpu.memory_space<vmem>>, vector<128x256xbf16>,
    } else {
    }
    return
  }
  func.func @transform_0(%arg0: i32, %arg1: i32) -> (i32, i32) {
    %c0_i32 = arith.constant 0 : i32
    return %arg0, %arg1 : i32, i32
  }
  func.func @transform_1(%arg0: i32, %arg1: i32) -> (i32, i32) {
    %c0_i32 = arith.constant 0 : i32
    %c0_i32_0 = arith.constant 0 : i32
    %c0_i32_1 = arith.constant 0 : i32
    return %c0_i32, %c0_i32_0 : i32, i32
  }
  func.func @transform_2(%arg0: i32, %arg1: i32) -> (i32, i32) {
    %c0_i32 = arith.constant 0 : i32
    %c0_i32_0 = arith.constant 0 : i32
    %c0_i32_1 = arith.constant 0 : i32
    return %c0_i32, %c0_i32_0 : i32, i32
  }
  func.func @transform_3(%arg0: i32, %arg1: i32) -> (i32, i32) {
    %c0_i32 = arith.constant 0 : i32
    %c0_i32_0 = arith.constant 0 : i32
    return %arg0, %c0_i32 : i32, i32
  }
}

</mosaic_0001>

<bundles_post_ra>
// kernel: tpu_custom_call.1
= control target key start
LH: loop header
LB: loop body
LE: loop exit
PB: predicated region body
PF: predicated region fallthrough
CT: control target
= control target key end

     0   :  { %8 = vsyncpa [#allocation4], 0  ;;  %s1971_s0 = inlined_call_operand.hbm [shape: bf16[256,256], index: 0, kind: input, shape index: {}]   ;;  %s1972_s1 = inlined_call_operand.hbm [shape: bf16[256,128], index: 1, kind: input, shape index: {}]   ;;  %s1973_s2 = inlined_call_operand.hbm [shape: bf16[128,256], index: 2, kind: input, shape index: {}]   ;;  %s1974_s3 = inlined_call_operand.hbm [shape: bf16[256,256], index: 3, kind: output, shape index: {}]  }
   0x1   :  { %10 = vsyncpa [#allocation4 + $0x1], 0 }
   0x2   :  { %11 = vsyncpa [#allocation7], 0 }
   0x3   :  { %12 = vsyncpa [#allocation5], 0 }
   0x4   :  { %14 = vsyncpa [#allocation5 + $0x1], 0  ;;  %s1661_s12 = smov 0   ;;  %s1663_s13 = smov 0  }
   0x5   :  { %s1665_s14 = smov 0   ;;  %s1667_s15 = smov 0  }
   0x6   :  { %s1669_s16 = smov 0   ;;  %s1671_s17 = smov 0  }
   0x7 LB: > { %s1133_s18 = sadd.s32 4294967295, %s1628_s17   ;;  %s1134_s19 = sadd.s32 4294967294, %s1628_s17   ;;  %s1628_s17 = sphi %s1671_s17, %s20_s17   ;;  %s1624_s16 = sphi %s1669_s16, %s1996_s16   ;;  %s1620_s15 = sphi %s1667_s15, %s1995_s15   ;;  %s1616_s14 = sphi %s1665_s14, %s1994_s14   ;;  %s1612_s13 = sphi %s1663_s13, %s1993_s13   ;;  %s1608_s12 = sphi %s1661_s12, %s1992_s12  }
   0x8   : > { %p54_p0 = scmp.ne.s32.totalorder %s1612_s13, %s1608_s12  ;;  %p1695_p1 = scmp.eq.s32.totalorder %s1133_s18, 0 }
   0x9   : > { %p1699_p2 = scmp.eq.s32.totalorder %s1133_s18, 1  ;;  %p126_p3 = scmp.eq.s32.totalorder %s1134_s19, 1 }
   0xa   : > { %s1979_s20 = scalar_select %p1695_p1, 1, 0 }
   0xb   : > { %p1705_p4 = por %p1695_p1, %p54_p0  ;;  %p1135_p5 = scmp.ge.s32.totalorder %s1628_s17, 1 }
   0xc   : > { %p1710_p6 = por %p126_p3, %p54_p0  ;;  %p133_p7 = scmp.lt.s32.totalorder %s1628_s17, 3 }
   0xd   : > { %s1981_s22 = scalar_select %p1705_p4, 1, 0 }
   0xe   : > { %s1982_s23 = scalar_select %p1710_p6, 1, 0 }
   0xf   : > { %p1715_p8 = pnand %p1135_p5, %p133_p7  ;;  %s1630_s25 = smov [#allocation6]  }
  0x10   : > { %s145_s26 = sshll.u32 %s1630_s25, 4  ;;  %s1631_s28 = smov [#allocation8]   ;;  %s1719_s26 = int_to_ptr.vmem [resolvable:$true] %s145_s26 }
  0x11   : > { %p1314_p9 = pneg %p1715_p8  ;;  %s158_s29 = sshll.u32 %s1631_s28, 4  ;;  %s1730_s29 = int_to_ptr.vmem [resolvable:$true] %s158_s29 }
  0x12   : > { %s1456_s5 = scalar_lea.hbm %s1972_s1, 2048 }
  0x13   : > { %p1726_p11 = pnand %p1314_p9, %p1695_p1  ;;  %p1457_p12 = scmp.ne.s32.totalorder %s1972_s1, %s1456_s5 }
  0x14   : > { %p1463_p5 = scmp.lt.u32.totalorder %s1456_s5, %s1972_s1 }
  0x15   : > { %p1458_p13 = pneg %p1726_p11 }
  0x17   : > { %p1459_p0 = pnand %p1458_p13, %p1457_p12 }
  0x19   : > { %p1460_p3 = pneg %p1459_p0 }
  0x1b   : > { %p1465_p7 = pnand %p1463_p5, %p1460_p3 }
  0x1d   : > { %1468 = shalt.err (!%p1465_p7)
}
  0x1e   : > { %s1469_s10 = scalar_lea.vmem %s1719_s26, 2048  ;;  %p1477_p1 = scmp.lt.s32.totalorder %s1719_s26, %s1719_s26 }
  0x1f   : > { %p1470_p9 = scmp.ne.s32.totalorder %s1719_s26, %s1469_s10  ;;  %p1478_p12 = scmp.lt.s32.totalorder %s1469_s10, %s1469_s10 }
  0x21   : > { %p1472_p10 = pnand %p1470_p9, %p1458_p13  ;;  %p1479_p0 = por %p1478_p12, %p1477_p1 }
  0x23   : > { %p1473_p6 = pneg %p1472_p10 }
  0x25   : > { %p1480_p4 = pnand %p1479_p0, %p1473_p6 }
  0x27   : > { %1483 = shalt.err (!%p1480_p4)
}
  0x28   : > { %s1632_s11 = smov 64   ;;  %s1633_s18 = smov 4  }
  0x29   : > { %1317 = dma.hbm_to_vmem [thread:$0]  (!%p1726_p11), %s1972_s1, 2048, %s1719_s26, [#allocation7], %s1632_s11, %s1632_s11, %s1633_s18  }
  0x2a   : > { %s1484_s4 = scalar_lea.hbm %s1973_s2, 2048 }
  0x2b   : > { %p1485_p1 = scmp.ne.s32.totalorder %s1973_s2, %s1484_s4  ;;  %p1491_p10 = scmp.lt.u32.totalorder %s1484_s4, %s1973_s2 }
  0x2d   : > { %p1487_p4 = pnand %p1485_p1, %p1458_p13 }
  0x2f   : > { %p1488_p6 = pneg %p1487_p4 }
  0x31   : > { %p1493_p3 = pnand %p1491_p10, %p1488_p6 }
  0x33   : > { %1496 = shalt.err (!%p1493_p3)
}
  0x34   : > { %s1497_s26 = scalar_lea.vmem %s1730_s29, 2048  ;;  %p1505_p12 = scmp.lt.s32.totalorder %s1730_s29, %s1730_s29 }
  0x35   : > { %p1498_p5 = scmp.ne.s32.totalorder %s1730_s29, %s1497_s26  ;;  %p1506_p0 = scmp.lt.s32.totalorder %s1497_s26, %s1497_s26 }
  0x37   : > { %p1500_p7 = pnand %p1498_p5, %p1458_p13  ;;  %p1507_p1 = por %p1506_p0, %p1505_p12 }
  0x39   : > { %p1501_p9 = pneg %p1500_p7 }
  0x3b   : > { %p1508_p4 = pnand %p1507_p1, %p1501_p9 }
  0x3d   : > { %1511 = shalt.err (!%p1508_p4)
}
  0x3e   : > { %s1634_s9 = smov 128   ;;  %s1635_s10 = smov 8  }
  0x3f   : > { %1320 = dma.hbm_to_vmem [thread:$0]  (!%p1726_p11), %s1973_s2, 2048, %s1730_s29, [#allocation7], %s1634_s9, %s1634_s9, %s1635_s10  }
  0x40   : > { %s32_s19 = sadd.s32 1, %s1624_s16  ;;  %s41_s25 = sadd.s32 1, %s1616_s14 }
  0x41   : > { %p34_p13 = scmp.ge.s32.totalorder %s32_s19, 2  ;;  %p48_p6 = scmp.ne.s32.totalorder %s1616_s14, %s1612_s13 }
  0x42   : > { %p49_p10 = scmp.eq.s32.totalorder %s1628_s17, 0  ;;  %p1331_p3 = scmp.lt.s32.totalorder %s1628_s17, 2 }
  0x43   : > { %s1998_s19 = smov (%p34_p13, %s32_s19), 0  ;;  %p1797_p7 = por %p1699_p2, %p48_p6 }
  0x44   : > { %p50_p5 = por %p49_p10, %p48_p6  ;;  %s36_s28 = ssub.s32 %s1624_s16, %s1998_s19 }
  0x45   : > { %s1985_s27 = scalar_select %p1797_p7, 1, 0 }
  0x46   : > { %s172_s30 = sand.u32 1, %s1616_s14   ;;  %p39_p9 = scmp.eq.s32.totalorder %s36_s28, 0 }
  0x47   : > { %s1139_s29 = sshll.u32 %s172_s30, 7  ;;  %s1219_s4 = sshll.u32 %s1624_s16, 11 }
  0x48   : > { %s1806_s5 = scalar_select %p39_p9, %s1616_s14, %s41_s25  }
  0x49   : > { %s1811_s8 = scalar_lea.hbm %s1971_s0, %s1219_s4  ;;  %s176_s21 = scalar_lea.vmem [#allocation3], %s1139_s29 }
  0x4a   : > { %s186_s26 = sshll.u32 %s176_s21, 4  ;;  %p1815_p2 = pnand %p1331_p3, %p50_p5  ;;  %s1819_s26 = int_to_ptr.vmem [resolvable:$true] %s186_s26 }
  0x4b   : > { %s1821_s18 = scalar_lea.sflag [#allocation4], %s172_s30  ;;  %s1512_s25 = scalar_lea.hbm %s1811_s8, 2048 }
  0x4c   : > { %p1513_p11 = scmp.ne.s32.totalorder %s1811_s8, %s1512_s25  ;;  %p1514_p12 = pneg %p1815_p2 }
  0x4d   : > { %s1517_s4 = scalar_lea.hbm %s1971_s0, 4096  ;;  %p1518_p4 = scmp.lt.u32.totalorder %s1811_s8, %s1971_s0 }
  0x4e   : > { %p1515_p0 = pnand %p1514_p12, %p1513_p11  ;;  %p1519_p13 = scmp.lt.u32.totalorder %s1517_s4, %s1512_s25 }
  0x4f   : > { %p1521_p10 = scmp.lt.u32.totalorder %s1512_s25, %s1811_s8 }
  0x50   : > { %p1516_p1 = pneg %p1515_p0  ;;  %p1520_p6 = por %p1519_p13, %p1518_p4 }
  0x52   : > { %p1522_p3 = por %p1521_p10, %p1520_p6 }
  0x54   : > { %p1523_p5 = pnand %p1522_p3, %p1516_p1 }
  0x56   : > { %1526 = shalt.err (!%p1523_p5)
}
  0x57   : > { %s1527_s30 = scalar_lea.vmem %s1819_s26, 2048  ;;  %s1636_s21 = smov [#allocation3]  }
  0x58   : > { %p1528_p9 = scmp.ne.s32.totalorder %s1819_s26, %s1527_s30  ;;  %s1532_s28 = sshll.u32 %s1636_s21, 4  ;;  %s1533_s28 = int_to_ptr.vmem [resolvable:$false] %s1532_s28 }
  0x59   : > { %s1534_s29 = scalar_lea.vmem %s1533_s28, 4096  ;;  %p1535_p7 = scmp.lt.s32.totalorder %s1819_s26, %s1533_s28 }
  0x5a   : > { %p1530_p11 = pnand %p1528_p9, %p1514_p12  ;;  %p1536_p4 = scmp.lt.s32.totalorder %s1534_s29, %s1527_s30 }
  0x5c   : > { %p1531_p0 = pneg %p1530_p11  ;;  %p1537_p13 = por %p1536_p4, %p1535_p7 }
  0x5e   : > { %p1538_p6 = pnand %p1537_p13, %p1531_p0 }
  0x60   : > { %1541 = shalt.err (!%p1538_p6)
}
  0x61   : > { %1324 = dma.hbm_to_vmem [thread:$0]  (!%p1815_p2), %s1811_s8, 2048, %s1819_s26, %s1821_s18, %s1634_s9, %s1634_s9, %s1635_s10  }
  0x62   : > { %198 = sbr.rel (%p1715_p8) target bundleno = 651 (0x28b), region = 32  ;;  %s1855_s25 = sand.u32 (!%p1715_p8), 1, %s1612_s13  }
  0x63   : > { %s1144_s4 = sshll.u32 (!%p1715_p8), %s1855_s25, 7  ;;  %s201_s6 = scalar_lea.sflag (!%p1715_p8), [#allocation4], %s1855_s25 }
  0x64   : > { %s1861_s11 = scalar_lea.vmem (!%p1715_p8), [#allocation3], %s1144_s4  ;;  %p1987_p7 = scmp.ne.s32.totalorder (!%p1715_p8), %s1981_s22, 0 }
  0x69   : > { %1595 = dma.done.wait (%p1987_p7), %s201_s6, 2048  }
  0x6a   : > { %1597 = vsyncadd (%p1987_p7), %s201_s6, 4294965248  ;;  %p1988_p2 = scmp.ne.s32.totalorder %s1979_s20, 0 }
  0x6c   : > { %1599 = dma.done.wait (%p1988_p2), [#allocation7], 4096  }
  0x6d   : > { %1601 = vsyncadd (%p1988_p2), [#allocation7], 4294963200  ;;  %v1392_v0 = vld [vmem:[#allocation6 + $0x40] sm:$0xff]   ;;  %v1394_v2 = vld [vmem:[#allocation6 + $0x48] sm:$0xff]   ;;  %v1637_v48 = vmov 0   ;;  %s1897_s20 = scalar_lea.vmem [#allocation9], %s1144_s4 }
  0x6e   : > { %v1393_v1 = vld [vmem:[#allocation6] sm:$0xff]   ;;  %1238 = vmatprep.subr.bf16.mxu0 %v1392_v0  ;;  %v1395_v3 = vld [vmem:[#allocation6 + $0x8] sm:$0xff]   ;;  %v1396_v4 = vld [vmem:[#allocation6 + $0x50] sm:$0xff]   ;;  %788 = vmatprep.mubr.bf16.mxu1 %v1637_v48  ;;  %s1237_s22 = sshll.u32 %s1620_s15, 11  ;;  %s1028_s24 = sshll.u32 %s1897_s20, 4  ;;  %s1920_s24 = int_to_ptr.vmem [resolvable:$true] %s1028_s24 }
  0x6f   : > { %1239 = vmatpush3.bf16.msra.mxu0 %v1393_v1  ;;  %v1397_v5 = vld [vmem:[#allocation6 + $0x10] sm:$0xff]   ;;  %v1398_v6 = vld [vmem:[#allocation6 + $0x58] sm:$0xff]   ;;  %v1400_v8 = vld [vmem:[#allocation6 + $0x60] sm:$0xff]   ;;  %s1918_s8 = scalar_lea.hbm %s1974_s3, %s1237_s22  ;;  %s1014_s26 = scalar_lea.sflag [#allocation5], %s1855_s25 }
  0x70   : > { %1240 = vmatprep.subr.bf16.mxu0 %v1394_v2  ;;  %v1399_v7 = vld [vmem:[#allocation6 + $0x18] sm:$0xff]   ;;  %v1401_v9 = vld [vmem:[#allocation6 + $0x20] sm:$0xff]   ;;  %v1402_v10 = vld [vmem:[#allocation6 + $0x68] sm:$0xff]   ;;  %s1542_s15 = scalar_lea.vmem %s1920_s24, 2048  ;;  %p1989_p12 = scmp.ne.s32.totalorder %s1985_s27, 0 }
  0x71   : > { %v1410_v11 = vld [vmem:[%s1861_s11 + $0x4] ss:$8 sps:$4 sm:$0xff]   ;;  %v1404_v13 = vld [vmem:[#allocation6 + $0x70] sm:$0xff]   ;;  %v1406_v15 = vld [vmem:[#allocation6 + $0x78] sm:$0xff]   ;;  %p1543_p8 = scmp.ne.s32.totalorder %s1920_s24, %s1542_s15  ;;  %s1638_s18 = smov [#allocation9]  }
  0x72   : > { %v1403_v12 = vld [vmem:[#allocation6 + $0x28] sm:$0xff]   ;;  %536 = vmatprep.mubr.bf16.mxu0 %v1410_v11  ;;  %v1405_v14 = vld [vmem:[#allocation6 + $0x30] sm:$0xff]   ;;  %v1407_v16 = vld [vmem:[#allocation6 + $0x38] sm:$0xff]   ;;  %s1546_s7 = sshll.u32 %s1638_s18, 4  ;;  %s1547_s7 = int_to_ptr.vmem [resolvable:$false] %s1546_s7 }
  0x73   : > { %1241 = vmatpush3.bf16.msra.mxu0 %v1395_v3  ;;  %v1432_v17 = vld [vmem:[#allocation8 + $0x4] ss:$8 sps:$4 sm:$0xff]   ;;  %v1434_v18 = vld [vmem:[#allocation8] ss:$8 sps:$4 sm:$0xff]   ;;  %v1435_v19 = vld [vmem:[#allocation8 + $0x14] ss:$8 sps:$4 sm:$0xff]   ;;  %p1544_p1 = pnand %p1543_p8, %p1989_p12  ;;  %p1549_p3 = scmp.lt.s32.totalorder %s1920_s24, %s1547_s7 }
  0x74   : > { %1242 = vmatprep.subr.bf16.mxu0 %v1396_v4  ;;  %756 = vmatprep.subr.bf16.mxu1 %v1432_v17  ;;  %v1408_v20 = vld [vmem:[%s1861_s11] ss:$8 sps:$4 sm:$0xff]   ;;  %v1437_v21 = vld [vmem:[#allocation8 + $0x10] ss:$8 sps:$4 sm:$0xff]   ;;  %v1411_v22 = vld [vmem:[%s1861_s11 + $0x14] ss:$8 sps:$4 sm:$0xff]  }
  0x75   : > { %757 = vmatpush1.bf16.msra.mxu1 %v1434_v18  ;;  %v1438_v23 = vld [vmem:[#allocation8 + $0x24] ss:$8 sps:$4 sm:$0xff]   ;;  %v1440_v24 = vld [vmem:[#allocation8 + $0x20] ss:$8 sps:$4 sm:$0xff]   ;;  %v1441_v25 = vld [vmem:[#allocation8 + $0x34] ss:$8 sps:$4 sm:$0xff]   ;;  %p1545_p10 = pneg %p1544_p1 }
  0x76   : > { %758 = vmatprep.subr.bf16.mxu1 %v1435_v19  ;;  %v1413_v26 = vld [vmem:[%s1861_s11 + $0x10] ss:$8 sps:$4 sm:$0xff]   ;;  %v1414_v28 = vld [vmem:[%s1861_s11 + $0x24] ss:$8 sps:$4 sm:$0xff]   ;;  %v1446_v30 = vld [vmem:[#allocation8 + $0x40] ss:$8 sps:$4 sm:$0xff]  }
  0x77   : > { %1243 = vmatpush3.bf16.msra.mxu0 %v1397_v5  ;;  %v1443_v27 = vld [vmem:[#allocation8 + $0x30] ss:$8 sps:$4 sm:$0xff]   ;;  %v1444_v29 = vld [vmem:[#allocation8 + $0x44] ss:$8 sps:$4 sm:$0xff]   ;;  %v1447_v31 = vld [vmem:[#allocation8 + $0x54] ss:$8 sps:$4 sm:$0xff]  }
  0x78   : > { %1244 = vmatprep.subr.bf16.mxu0 %v1398_v6  ;;  %v1416_v32 = vld [vmem:[%s1861_s11 + $0x20] ss:$8 sps:$4 sm:$0xff]   ;;  %v1449_v33 = vld [vmem:[#allocation8 + $0x50] ss:$8 sps:$4 sm:$0xff]   ;;  %v1417_v34 = vld [vmem:[%s1861_s11 + $0x34] ss:$8 sps:$4 sm:$0xff]  }
  0x79   : > { %759 = vmatpush1.bf16.msra.mxu1 %v1437_v21  ;;  %v1419_v35 = vld [vmem:[%s1861_s11 + $0x30] ss:$8 sps:$4 sm:$0xff]   ;;  %v1420_v36 = vld [vmem:[%s1861_s11 + $0x44] ss:$8 sps:$4 sm:$0xff]   ;;  %v1422_v37 = vld [vmem:[%s1861_s11 + $0x40] ss:$8 sps:$4 sm:$0xff]  }
  0x7a   : > { %760 = vmatprep.subr.bf16.mxu1 %v1438_v23  ;;  %v1423_v38 = vld [vmem:[%s1861_s11 + $0x54] ss:$8 sps:$4 sm:$0xff]   ;;  %v1425_v39 = vld [vmem:[%s1861_s11 + $0x50] ss:$8 sps:$4 sm:$0xff]   ;;  %v1426_v40 = vld [vmem:[%s1861_s11 + $0x64] ss:$8 sps:$4 sm:$0xff]  }
  0x7b   : > { %1245 = vmatpush3.bf16.msra.mxu0 %v1399_v7  ;;  %v1428_v41 = vld [vmem:[%s1861_s11 + $0x60] ss:$8 sps:$4 sm:$0xff]   ;;  %v1429_v42 = vld [vmem:[%s1861_s11 + $0x74] ss:$8 sps:$4 sm:$0xff]   ;;  %v1431_v43 = vld [vmem:[%s1861_s11 + $0x70] ss:$8 sps:$4 sm:$0xff]  }
  0x7c   : > { %1246 = vmatprep.subr.bf16.mxu0 %v1400_v8  ;;  %v1450_v44 = vld [vmem:[#allocation8 + $0x64] ss:$8 sps:$4 sm:$0xff]   ;;  %v1452_v45 = vld [vmem:[#allocation8 + $0x60] ss:$8 sps:$4 sm:$0xff]   ;;  %v1453_v46 = vld [vmem:[#allocation8 + $0x74] ss:$8 sps:$4 sm:$0xff]  }
  0x7d   : > { %761 = vmatpush1.bf16.msra.mxu1 %v1440_v24  ;;  %v1455_v47 = vld [vmem:[#allocation8 + $0x70] ss:$8 sps:$4 sm:$0xff]   ;;  %s1548_s30 = scalar_lea.vmem %s1547_s7, 4096 }
  0x7e   : > { %762 = vmatprep.subr.bf16.mxu1 %v1441_v25  ;;  %p1550_p5 = scmp.lt.s32.totalorder %s1548_s30, %s1542_s15 }
  0x7f   : > { %1247 = vmatpush3.bf16.msra.mxu0 %v1401_v9 }
  0x80   : > { %1248 = vmatprep.subr.bf16.mxu0 %v1402_v10  ;;  %p1551_p9 = por %p1550_p5, %p1549_p3 }
  0x81   : > { %763 = vmatpush1.bf16.msra.mxu1 %v1443_v27 }
  0x82   : > { %764 = vmatprep.subr.bf16.mxu1 %v1444_v29  ;;  %p1552_p11 = pnand %p1551_p9, %p1545_p10 }
  0x83   : > { %1249 = vmatpush3.bf16.msra.mxu0 %v1403_v12 }
  0x84   : > { %1250 = vmatprep.subr.bf16.mxu0 %v1404_v13 }
  0x85   : > { %765 = vmatpush1.bf16.msra.mxu1 %v1446_v30 }
  0x86   : > { %766 = vmatprep.subr.bf16.mxu1 %v1447_v31 }
  0x87   : > { %1251 = vmatpush3.bf16.msra.mxu0 %v1405_v14 }
  0x88   : > { %1252 = vmatprep.subr.bf16.mxu0 %v1406_v15 }
  0x89   : > { %767 = vmatpush1.bf16.msra.mxu1 %v1449_v33 }
  0x8a   : > { %768 = vmatprep.subr.bf16.mxu1 %v1450_v44 }
  0x8b   : > { %1253 = vmatpush3.bf16.msra.mxu0 %v1407_v16 }
  0x8d   : > { %769 = vmatpush1.bf16.msra.mxu1 %v1452_v45 }
  0x8e   : > { %537 = vmatmul.mubr.bf16.vlgmr.msra.gmra.mrb[0].mxu0 %v1408_v20  ;;  %770 = vmatprep.subr.bf16.mxu1 %v1453_v46 }
  0x8f   : > { %544 = vmatprep.mubr.bf16.mxu0 %v1411_v22 }
  0x91   : > { %771 = vmatpush1.bf16.msra.mxu1 %v1455_v47 }
  0x96   : > { %545 = vmatmul.mubr.bf16.gmra.mrb[4].mxu0 %v1413_v26 }
  0x97   : > { %552 = vmatprep.mubr.bf16.mxu0 %v1414_v28 }
  0x9e   : > { %553 = vmatmul.mubr.bf16.gmra.mrb[8].mxu0 %v1416_v32 }
  0x9f   : > { %560 = vmatprep.mubr.bf16.mxu0 %v1417_v34 }
  0xa6   : > { %561 = vmatmul.mubr.bf16.gmra.mrb[12].mxu0 %v1419_v35 }
  0xa7   : > { %568 = vmatprep.mubr.bf16.mxu0 %v1420_v36 }
  0xae   : > { %569 = vmatmul.mubr.bf16.gmra.mrb[16].mxu0 %v1422_v37 }
  0xaf   : > { %576 = vmatprep.mubr.bf16.mxu0 %v1423_v38 }
  0xb6   : > { %577 = vmatmul.mubr.bf16.gmra.mrb[20].mxu0 %v1425_v39 }
  0xb7   : > { %584 = vmatprep.mubr.bf16.mxu0 %v1426_v40 }
  0xbe   : > { %585 = vmatmul.mubr.bf16.gmra.mrb[24].mxu0 %v1428_v41 }
  0xbf   : > { %592 = vmatprep.mubr.bf16.mxu0 %v1429_v42 }
  0xc6   : > { %593 = vmatmul.mubr.bf16.gmra.mrb[28].mxu0 %v1431_v43 }
 0x161   : > { %v1254_v49 = vpop.f32.mrb[0].mxu0 }
 0x162   : > { %v1255_v50 = vpop.f32.mrb[1].mxu0 }
 0x163   : > { %v1256_v51 = vadd.f32 %v1255_v50, %v1254_v49  ;;  %v1257_v52 = vpop.f32.mrb[2].mxu0 }
 0x164   : > { %v1258_v53 = vpop.f32.mrb[3].mxu0 }
 0x165   : > { %v1259_v54 = vadd.f32 %v1258_v53, %v1257_v52 }
 0x167   : > { %v652_v55 = vpack.c.bf16 %v1259_v54, %v1256_v51 }
 0x169   : > { %v1260_v56 = vpop.f32.mrb[4].mxu0  ;;  %789 = vmatmul.mubr.bf16.vlgmr.msra.gmra.mrb[0].mxu1 %v652_v55 }
 0x16a   : > { %v1261_v57 = vpop.f32.mrb[5].mxu0  ;;  %798 = vmatprep.mubr.bf16.mxu1 %v1637_v48 }
 0x16b   : > { %v1262_v58 = vadd.f32 %v1261_v57, %v1260_v56  ;;  %v1263_v59 = vpop.f32.mrb[6].mxu0 }
 0x16c   : > { %v1264_v60 = vpop.f32.mrb[7].mxu0 }
 0x16d   : > { %v1265_v61 = vadd.f32 %v1264_v60, %v1263_v59 }
 0x16f   : > { %v653_v62 = vpack.c.bf16 %v1265_v61, %v1262_v58 }
 0x171   : > { %v1266_v63 = vpop.f32.mrb[8].mxu0  ;;  %799 = vmatmul.mubr.bf16.gmra.mrb[4].mxu1 %v653_v62 }
 0x172   : > { %v1267_v0 = vpop.f32.mrb[9].mxu0  ;;  %808 = vmatprep.mubr.bf16.mxu1 %v1637_v48 }
 0x173   : > { %v1268_v1 = vadd.f32 %v1267_v0, %v1266_v63  ;;  %v1269_v2 = vpop.f32.mrb[10].mxu0 }
 0x174   : > { %v1270_v3 = vpop.f32.mrb[11].mxu0 }
 0x175   : > { %v1271_v4 = vadd.f32 %v1270_v3, %v1269_v2 }
 0x177   : > { %v654_v5 = vpack.c.bf16 %v1271_v4, %v1268_v1 }
 0x179   : > { %v1272_v6 = vpop.f32.mrb[12].mxu0  ;;  %809 = vmatmul.mubr.bf16.gmra.mrb[8].mxu1 %v654_v5 }
 0x17a   : > { %v1273_v7 = vpop.f32.mrb[13].mxu0  ;;  %818 = vmatprep.mubr.bf16.mxu1 %v1637_v48 }
 0x17b   : > { %v1274_v8 = vadd.f32 %v1273_v7, %v1272_v6  ;;  %v1275_v9 = vpop.f32.mrb[14].mxu0 }
 0x17c   : > { %v1276_v10 = vpop.f32.mrb[15].mxu0 }
 0x17d   : > { %v1277_v11 = vadd.f32 %v1276_v10, %v1275_v9 }
 0x17f   : > { %v655_v12 = vpack.c.bf16 %v1277_v11, %v1274_v8 }
 0x181   : > { %v1278_v13 = vpop.f32.mrb[16].mxu0  ;;  %819 = vmatmul.mubr.bf16.gmra.mrb[12].mxu1 %v655_v12 }
 0x182   : > { %v1279_v14 = vpop.f32.mrb[17].mxu0  ;;  %828 = vmatprep.mubr.bf16.mxu1 %v1637_v48 }
 0x183   : > { %v1280_v15 = vadd.f32 %v1279_v14, %v1278_v13  ;;  %v1281_v16 = vpop.f32.mrb[18].mxu0 }
 0x184   : > { %v1282_v17 = vpop.f32.mrb[19].mxu0 }
 0x185   : > { %v1283_v18 = vadd.f32 %v1282_v17, %v1281_v16 }
 0x187   : > { %v656_v19 = vpack.c.bf16 %v1283_v18, %v1280_v15 }
 0x189   : > { %v1284_v20 = vpop.f32.mrb[20].mxu0  ;;  %829 = vmatmul.mubr.bf16.gmra.mrb[16].mxu1 %v656_v19 }
 0x18a   : > { %v1285_v21 = vpop.f32.mrb[21].mxu0  ;;  %838 = vmatprep.mubr.bf16.mxu1 %v1637_v48 }
 0x18b   : > { %v1286_v22 = vadd.f32 %v1285_v21, %v1284_v20  ;;  %v1287_v23 = vpop.f32.mrb[22].mxu0 }
 0x18c   : > { %v1288_v24 = vpop.f32.mrb[23].mxu0 }
 0x18d   : > { %v1289_v25 = vadd.f32 %v1288_v24, %v1287_v23 }
 0x18f   : > { %v657_v26 = vpack.c.bf16 %v1289_v25, %v1286_v22 }
 0x191   : > { %v1290_v27 = vpop.f32.mrb[24].mxu0  ;;  %839 = vmatmul.mubr.bf16.gmra.mrb[20].mxu1 %v657_v26 }
 0x192   : > { %v1291_v28 = vpop.f32.mrb[25].mxu0  ;;  %848 = vmatprep.mubr.bf16.mxu1 %v1637_v48 }
 0x193   : > { %v1292_v29 = vadd.f32 %v1291_v28, %v1290_v27  ;;  %v1293_v30 = vpop.f32.mrb[26].mxu0 }
 0x194   : > { %v1294_v31 = vpop.f32.mrb[27].mxu0 }
 0x195   : > { %v1295_v32 = vadd.f32 %v1294_v31, %v1293_v30 }
 0x197   : > { %v658_v33 = vpack.c.bf16 %v1295_v32, %v1292_v29 }
 0x199   : > { %v1296_v34 = vpop.f32.mrb[28].mxu0  ;;  %849 = vmatmul.mubr.bf16.gmra.mrb[24].mxu1 %v658_v33 }
 0x19a   : > { %v1297_v35 = vpop.f32.mrb[29].mxu0  ;;  %858 = vmatprep.mubr.bf16.mxu1 %v1637_v48 }
 0x19b   : > { %v1298_v36 = vadd.f32 %v1297_v35, %v1296_v34  ;;  %v1299_v37 = vpop.f32.mrb[30].mxu0 }
 0x19c   : > { %v1300_v38 = vpop.f32.mrb[31].mxu0 }
 0x19d   : > { %v1301_v39 = vadd.f32 %v1300_v38, %v1299_v37 }
 0x19f   : > { %v659_v40 = vpack.c.bf16 %v1301_v39, %v1298_v36 }
 0x1a1   : > { %859 = vmatmul.mubr.bf16.gmra.mrb[28].mxu1 %v659_v40 }
 0x23c   : > { %v790_v41 = vpop.f32.mrb[0].mxu1 }
 0x23d   : > { %v869_v42 = vmax.f32 %v790_v41, 0.0  ;;  %v792_v43 = vpop.f32.mrb[1].mxu1 }
 0x23e   : > { %v870_v44 = vmax.f32 %v792_v43, 0.0  ;;  %v794_v45 = vpop.f32.mrb[2].mxu1 }
 0x23f   : > { %v871_v46 = vmax.f32 %v794_v45, 0.0  ;;  %v796_v47 = vpop.f32.mrb[3].mxu1 }
 0x240   : > { %v1220_v49 = vpack.c.bf16 %v870_v44, %v869_v42  ;;  %v872_v50 = vmax.f32 %v796_v47, 0.0 }
 0x242   : > { %997 = vst [vmem:[%s1897_s20] sm:$0xff] %v1220_v49  ;;  %v1221_v48 = vpack.c.bf16 %v872_v50, %v871_v46 }
 0x244   : > { %998 = vst [vmem:[%s1897_s20 + $0x8] sm:$0xff] %v1221_v48  ;;  %v800_v51 = vpop.f32.mrb[4].mxu1 }
 0x245   : > { %v873_v52 = vmax.f32 %v800_v51, 0.0  ;;  %v802_v53 = vpop.f32.mrb[5].mxu1 }
 0x246   : > { %v874_v54 = vmax.f32 %v802_v53, 0.0  ;;  %v804_v55 = vpop.f32.mrb[6].mxu1 }
 0x247   : > { %v875_v56 = vmax.f32 %v804_v55, 0.0  ;;  %v806_v57 = vpop.f32.mrb[7].mxu1 }
 0x248   : > { %v1222_v58 = vpack.c.bf16 %v874_v54, %v873_v52  ;;  %v876_v59 = vmax.f32 %v806_v57, 0.0 }
 0x24a   : > { %999 = vst [vmem:[%s1897_s20 + $0x10] sm:$0xff] %v1222_v58  ;;  %v1223_v60 = vpack.c.bf16 %v876_v59, %v875_v56 }
 0x24c   : > { %1000 = vst [vmem:[%s1897_s20 + $0x18] sm:$0xff] %v1223_v60  ;;  %v810_v61 = vpop.f32.mrb[8].mxu1 }
 0x24d   : > { %v877_v62 = vmax.f32 %v810_v61, 0.0  ;;  %v812_v63 = vpop.f32.mrb[9].mxu1 }
 0x24e   : > { %v878_v0 = vmax.f32 %v812_v63, 0.0  ;;  %v814_v1 = vpop.f32.mrb[10].mxu1 }
 0x24f   : > { %v879_v2 = vmax.f32 %v814_v1, 0.0  ;;  %v816_v3 = vpop.f32.mrb[11].mxu1 }
 0x250   : > { %v1224_v4 = vpack.c.bf16 %v878_v0, %v877_v62  ;;  %v880_v5 = vmax.f32 %v816_v3, 0.0 }
 0x252   : > { %1001 = vst [vmem:[%s1897_s20 + $0x20] sm:$0xff] %v1224_v4  ;;  %v1225_v6 = vpack.c.bf16 %v880_v5, %v879_v2 }
 0x254   : > { %1002 = vst [vmem:[%s1897_s20 + $0x28] sm:$0xff] %v1225_v6  ;;  %v820_v7 = vpop.f32.mrb[12].mxu1 }
 0x255   : > { %v881_v8 = vmax.f32 %v820_v7, 0.0  ;;  %v822_v9 = vpop.f32.mrb[13].mxu1 }
 0x256   : > { %v882_v10 = vmax.f32 %v822_v9, 0.0  ;;  %v824_v11 = vpop.f32.mrb[14].mxu1 }
 0x257   : > { %v883_v12 = vmax.f32 %v824_v11, 0.0  ;;  %v826_v13 = vpop.f32.mrb[15].mxu1 }
 0x258   : > { %v1226_v14 = vpack.c.bf16 %v882_v10, %v881_v8  ;;  %v884_v15 = vmax.f32 %v826_v13, 0.0 }
 0x25a   : > { %1003 = vst [vmem:[%s1897_s20 + $0x30] sm:$0xff] %v1226_v14  ;;  %v1227_v16 = vpack.c.bf16 %v884_v15, %v883_v12 }
 0x25c   : > { %1004 = vst [vmem:[%s1897_s20 + $0x38] sm:$0xff] %v1227_v16  ;;  %v830_v17 = vpop.f32.mrb[16].mxu1 }
 0x25d   : > { %v885_v18 = vmax.f32 %v830_v17, 0.0  ;;  %v832_v19 = vpop.f32.mrb[17].mxu1 }
 0x25e   : > { %v886_v20 = vmax.f32 %v832_v19, 0.0  ;;  %v834_v21 = vpop.f32.mrb[18].mxu1 }
 0x25f   : > { %v887_v22 = vmax.f32 %v834_v21, 0.0  ;;  %v836_v23 = vpop.f32.mrb[19].mxu1 }
 0x260   : > { %v1228_v24 = vpack.c.bf16 %v886_v20, %v885_v18  ;;  %v888_v25 = vmax.f32 %v836_v23, 0.0 }
 0x262   : > { %1005 = vst [vmem:[%s1897_s20 + $0x40] sm:$0xff] %v1228_v24  ;;  %v1229_v26 = vpack.c.bf16 %v888_v25, %v887_v22 }
 0x264   : > { %1006 = vst [vmem:[%s1897_s20 + $0x48] sm:$0xff] %v1229_v26  ;;  %v840_v27 = vpop.f32.mrb[20].mxu1 }
 0x265   : > { %v889_v28 = vmax.f32 %v840_v27, 0.0  ;;  %v842_v29 = vpop.f32.mrb[21].mxu1 }
 0x266   : > { %v890_v30 = vmax.f32 %v842_v29, 0.0  ;;  %v844_v31 = vpop.f32.mrb[22].mxu1 }
 0x267   : > { %v891_v32 = vmax.f32 %v844_v31, 0.0  ;;  %v846_v33 = vpop.f32.mrb[23].mxu1 }
 0x268   : > { %v1230_v34 = vpack.c.bf16 %v890_v30, %v889_v28  ;;  %v892_v35 = vmax.f32 %v846_v33, 0.0 }
 0x26a   : > { %1007 = vst [vmem:[%s1897_s20 + $0x50] sm:$0xff] %v1230_v34  ;;  %v1231_v36 = vpack.c.bf16 %v892_v35, %v891_v32 }
 0x26c   : > { %1008 = vst [vmem:[%s1897_s20 + $0x58] sm:$0xff] %v1231_v36  ;;  %v850_v37 = vpop.f32.mrb[24].mxu1 }
 0x26d   : > { %v893_v38 = vmax.f32 %v850_v37, 0.0  ;;  %v852_v39 = vpop.f32.mrb[25].mxu1 }
 0x26e   : > { %v894_v40 = vmax.f32 %v852_v39, 0.0  ;;  %v854_v41 = vpop.f32.mrb[26].mxu1 }
 0x26f   : > { %v895_v42 = vmax.f32 %v854_v41, 0.0  ;;  %v856_v43 = vpop.f32.mrb[27].mxu1 }
 0x270   : > { %v1232_v44 = vpack.c.bf16 %v894_v40, %v893_v38  ;;  %v896_v45 = vmax.f32 %v856_v43, 0.0 }
 0x272   : > { %1009 = vst [vmem:[%s1897_s20 + $0x60] sm:$0xff] %v1232_v44  ;;  %v1233_v46 = vpack.c.bf16 %v896_v45, %v895_v42 }
 0x274   : > { %1010 = vst [vmem:[%s1897_s20 + $0x68] sm:$0xff] %v1233_v46  ;;  %v860_v47 = vpop.f32.mrb[28].mxu1 }
 0x275   : > { %v897_v49 = vmax.f32 %v860_v47, 0.0  ;;  %v862_v50 = vpop.f32.mrb[29].mxu1 }
 0x276   : > { %v898_v48 = vmax.f32 %v862_v50, 0.0  ;;  %v864_v51 = vpop.f32.mrb[30].mxu1 }
 0x277   : > { %v899_v52 = vmax.f32 %v864_v51, 0.0  ;;  %v866_v53 = vpop.f32.mrb[31].mxu1 }
 0x278   : > { %v1234_v54 = vpack.c.bf16 %v898_v48, %v897_v49  ;;  %v900_v55 = vmax.f32 %v866_v53, 0.0 }
 0x27a   : > { %1011 = vst [vmem:[%s1897_s20 + $0x70] sm:$0xff] %v1234_v54  ;;  %v1235_v56 = vpack.c.bf16 %v900_v55, %v899_v52 }
 0x27c   : > { %1012 = vst [vmem:[%s1897_s20 + $0x78] sm:$0xff] %v1235_v56 }
 0x27d   : > { %1555 = shalt.err (!%p1552_p11)
}
 0x27e   : > { %s1556_s21 = scalar_lea.hbm %s1918_s8, 2048  ;;  %s1560_s4 = scalar_lea.hbm %s1974_s3, 4096 }
 0x27f   : > { %p1557_p0 = scmp.ne.s32.totalorder %s1918_s8, %s1556_s21  ;;  %p1561_p6 = scmp.lt.u32.totalorder %s1918_s8, %s1974_s3 }
 0x280   : > { %p1562_p7 = scmp.lt.u32.totalorder %s1560_s4, %s1556_s21  ;;  %p1564_p8 = scmp.lt.u32.totalorder %s1556_s21, %s1918_s8 }
 0x281   : > { %p1558_p4 = pnand %p1557_p0, %p1989_p12 }
 0x282   : > { %p1563_p2 = por %p1562_p7, %p1561_p6 }
 0x283   : > { %p1559_p13 = pneg %p1558_p4 }
 0x284   : > { %p1565_p1 = por %p1564_p8, %p1563_p2 }
 0x286   : > { %p1566_p10 = pnand %p1565_p1, %p1559_p13 }
 0x288   : > { %1569 = shalt.err (!%p1566_p10)
}
 0x289   : > { %s1639_s20 = smov 128   ;;  %s1640_s22 = smov 8  }
 0x28a   : > { %1312 = dma.vmem_to_hbm [thread:$0]  (%p1989_p12), %s1920_s24, 2048, %s1918_s8, %s1014_s26, %s1639_s20, %s1639_s20, %s1640_s22  }
 0x28b PF: > { %s1043_s9 = sand.u32 1, %s1608_s12   ;;  %p1990_p3 = scmp.ne.s32.totalorder %s1982_s23, 0 }
 0x28c   : > { %p1991_p5 = scmp.ge.s32.totalorder %s1628_s17, 2  ;;  %s1044_s10 = scalar_lea.sflag [#allocation5], %s1043_s9 }
 0x28e   : > { %p1326_p9 = pnand %p1991_p5, %p1990_p3 }
 0x290   : > { %1603 = dma.done.wait (!%p1326_p9), %s1044_s10, 2048  }
 0x291   : > { %1605 = vsyncadd (!%p1326_p9), %s1044_s10, 4294965248  ;;  %s20_s17 = sadd.s32 1, %s1628_s17   ;;  %s1992_s12 = smov %s1612_s13 }
 0x292   : > { %p17_p11 = scmp.ge.s32.totalorder %s20_s17, 4   ;;  %s1993_s13 = smov %s1616_s14 }
 0x293   : > { %s1994_s14 = smov %s1806_s5  ;;  %s1995_s15 = smov %s1624_s16 }
 0x294   : > { %s1996_s16 = smov %s1998_s19  ;;  %19 = sbr.rel (!%p17_p11) target bundleno = 7 (0x7), region = 94 }
 0x29b   :  { %1049 = vsyncpa [#allocation4], 1 }
 0x29c   :  { %1051 = vsyncpa [#allocation4 + $0x1], 1 }
 0x29d   :  { %1052 = vsyncpa [#allocation7], 1 }
 0x29e   :  { %1053 = vsyncpa [#allocation5], 1 }
 0x29f   :  { %1055 = vsyncpa [#allocation5 + $0x1], 1 }

</bundles_post_ra>
